<compile_context>
chip_gen: v6e
topology: v6e:2x2x1
jax: 0.10.0
libtpu: 0.0.40
codegen_flags: <defaults>
</compile_context>

<pallas_src>
import jax
import jax.numpy as jnp
from jax.experimental import pallas as pl
from jax.experimental.pallas import tpu as pltpu


# ---------------------------------------------------------------------------
# pltpu.roll convention probe (cached, eager).
# ---------------------------------------------------------------------------
_ROLL_DOWN = None


def _roll_is_down():
    """True iff pltpu.roll(x, k, axis=0) moves data toward higher indices
    (jnp.roll convention).  Probed once with a tiny eager pallas_call; its inputs
    are concrete, so it also works when first hit while tracing an outer jit."""
    global _ROLL_DOWN
    if _ROLL_DOWN is None:
        def kernel(x_ref, o_ref):
            o_ref[...] = pltpu.roll(x_ref[...], 1, axis=0)

        x = jnp.arange(8 * 128, dtype=jnp.float32).reshape(8, 128)
        y = pl.pallas_call(
            kernel, out_shape=jax.ShapeDtypeStruct((8, 128), jnp.float32))(x)
        _ROLL_DOWN = bool(y[1, 0] == x[0, 0])
    return _ROLL_DOWN


def _shift(s, size, roll_down):
    """pltpu.roll shift amount so that result[p] = x[(p + s) % size]."""
    return (-s) % size if roll_down else s % size


# ---------------------------------------------------------------------------
# Static per-layer step descriptor.
# ---------------------------------------------------------------------------
def _step(name, H, W, cin, cout, *, taps=9, emit_raw=False, pool=False,
          save_skip=False, add_skip=False, raw_cout=None):
    if taps == 9 or pool:
        assert (W & (W - 1)) == 0, "W must be a power of two (masks use & (W-1))"
    return dict(name=name, H=H, W=W, cin=cin, cout=cout, taps=taps,
                emit_raw=emit_raw, pool=pool, save_skip=save_skip,
                add_skip=add_skip, raw_cout=cout if raw_cout is None else raw_cout)


# ---------------------------------------------------------------------------
# Fused conv-chain kernel: a sequence of [3x3 conv + folded BN + ReLU
# [+ residual] [+ 2x2 maxpool]] steps for one image, all activations kept in VMEM.
# ---------------------------------------------------------------------------
def _make_chain_kernel(plan, roll_down):
    n_steps = len(plan)
    has_col = any(st["taps"] == 9 for st in plan)
    has_pool = any(st["pool"] for st in plan)

    def kernel(*refs):
        it = iter(refs)
        x_ref = next(it)                                        # (1, HW0, K0) bf16
        wsb = [(next(it), next(it), next(it)) for _ in range(n_steps)]
        raw_refs = [next(it) if st["emit_raw"] else None for st in plan]
        main_ref = next(it)                                     # (1, HW_out, Cout) bf16
        col_ref = next(it) if has_col else None                 # im2col scratch, bf16
        pool_ref = next(it) if has_pool else None               # pool scratch, f32

        # Boundary predicates, hoisted out of the tap loop and memoised per (H, W).
        pred_cache = {}

        def predicates(H, W):
            if (H, W) not in pred_cache:
                HW = H * W
                flat = jax.lax.broadcasted_iota(jnp.int32, (HW, 1), 0)
                colp = flat & (W - 1)
                pred_cache[(H, W)] = dict(top=flat >= W, bot=flat < HW - W,
                                          left=colp >= 1, right=colp < W - 1)
            return pred_cache[(H, W)]

        x = x_ref[0]                                            # (HW, Cin) bf16
        skip = None
        for si, st in enumerate(plan):
            H, W, cin, cout = st["H"], st["W"], st["cin"], st["cout"]
            HW = H * W
            w_ref, s_ref, b_ref = wsb[si]

            if st["save_skip"]:
                skip = x

            if st["taps"] == 1:
                # Input was already im2col'd (layer 0): one MXU matmul.
                acc = jnp.dot(x, w_ref[...], preferred_element_type=jnp.float32)
            else:
                # Build the im2col operand in VMEM: 9 shifted (XLU roll), boundary
                # masked copies of the input, stored tap-major at 128-aligned lane
                # offsets; then ONE bf16 matmul using the full MXU K depth.
                pr = predicates(H, W)
                xf = x.astype(jnp.float32)
                for dy in range(3):
                    for dx in range(3):
                        k = dy * 3 + dx
                        s = (dy - 1) * W + (dx - 1)
                        xt = xf if s == 0 else pltpu.roll(
                            xf, _shift(s, HW, roll_down), axis=0)
                        m = None
                        if dy == 0:
                            m = pr["top"]
                        elif dy == 2:
                            m = pr["bot"]
                        if dx == 0:
                            m = pr["left"] if m is None else m & pr["left"]
                        elif dx == 2:
                            m = pr["right"] if m is None else m & pr["right"]
                        if m is not None:
                            xt = jnp.where(m, xt, 0.0)
                        col_ref[0:HW, k * cin:(k + 1) * cin] = xt.astype(jnp.bfloat16)
                acc = jnp.dot(col_ref[0:HW, 0:9 * cin], w_ref[...],
                              preferred_element_type=jnp.float32)

            if st["emit_raw"]:
                rc = st["raw_cout"]
                raw_refs[si][0] = acc if rc == cout else acc[:, 0:rc]

            # Folded BN + ReLU; residual is added AFTER the ReLU, matching the
            # reference ResidualBlock (out = relu(bn2(conv2)); out += residual).
            y = jnp.maximum(acc * s_ref[...] + b_ref[...], 0.0)
            if st["add_skip"]:
                y = y + skip.astype(jnp.float32)

            if st["pool"]:
                Ho, Wo = H // 2, W // 2
                # 2x2 / stride-2 max pool: pre-reduce with two rolls so each output
                # row needs a single stride-2 sublane gather; assemble the pooled
                # plane and keep it flattened as (Ho*Wo, Cout).
                z = jnp.maximum(y, pltpu.roll(y, _shift(W, HW, roll_down), axis=0))
                z = jnp.maximum(z, pltpu.roll(z, _shift(1, HW, roll_down), axis=0))
                pool_ref[0:HW, 0:cout] = z
                rows = [pool_ref[pl.ds(2 * ho * W, Wo, stride=2), 0:cout]
                        for ho in range(Ho)]
                y = jnp.concatenate(rows, axis=0) if Ho > 1 else rows[0]

            x = y.astype(jnp.bfloat16)

        main_ref[0] = x                                         # single lane-dense store

    return kernel


def conv_chain(x, layers, plan):
    """Run a chain of fused conv steps as ONE pallas_call (grid over the batch).

    x:      (N, HW0, K0) bf16 activations (flattened spatial on sublanes, C on lanes).
    layers: list of (w_flat (K, Cout) bf16, scale (1, Cout) f32, bias (1, Cout) f32).
    Returns (main, [raw activations in plan order]).
    """
    N = x.shape[0]
    assert x.shape[1] == plan[0]["H"] * plan[0]["W"]
    roll_down = _roll_is_down()
    kernel = _make_chain_kernel(plan, roll_down)

    in_specs = [pl.BlockSpec((1,) + x.shape[1:], lambda n: (n, 0, 0))]
    args = [x]
    for (w, s, b) in layers:
        in_specs.append(pl.BlockSpec(w.shape, lambda n: (0, 0)))
        in_specs.append(pl.BlockSpec(s.shape, lambda n: (0, 0)))
        in_specs.append(pl.BlockSpec(b.shape, lambda n: (0, 0)))
        args += [w, s, b]

    out_shapes, out_specs = [], []
    for st in plan:
        if st["emit_raw"]:
            hw = st["H"] * st["W"]
            out_shapes.append(jax.ShapeDtypeStruct((N, hw, st["raw_cout"]), jnp.float32))
            out_specs.append(pl.BlockSpec((1, hw, st["raw_cout"]), lambda n: (n, 0, 0)))
    last = plan[-1]
    hw_out = last["H"] * last["W"] // (4 if last["pool"] else 1)
    out_shapes.append(jax.ShapeDtypeStruct((N, hw_out, last["cout"]), jnp.bfloat16))
    out_specs.append(pl.BlockSpec((1, hw_out, last["cout"]), lambda n: (n, 0, 0)))

    scratch = []
    col_steps = [st for st in plan if st["taps"] == 9]
    if col_steps:
        scratch.append(pltpu.VMEM(
            (max(st["H"] * st["W"] for st in col_steps),
             max(9 * st["cin"] for st in col_steps)), jnp.bfloat16))
    pool_steps = [st for st in plan if st["pool"]]
    if pool_steps:
        scratch.append(pltpu.VMEM(
            (max(st["H"] * st["W"] for st in pool_steps),
             max(st["cout"] for st in pool_steps)), jnp.float32))

    outs = pl.pallas_call(
        kernel,
        out_shape=tuple(out_shapes),
        grid=(N,),
        in_specs=in_specs,
        out_specs=tuple(out_specs),
        scratch_shapes=scratch,
        compiler_params=pltpu.CompilerParams(dimension_semantics=("parallel",)),
    )(*args)
    outs = list(outs)
    return outs[-1], outs[:-1]


# ---------------------------------------------------------------------------
# Parameter preparation: (9, Cin, Cout) conv weights -> (9*Cin, Cout) bf16,
# tap-major along K (matching the in-kernel im2col layout).  c0's Cout is zero
# padded to 128 so c1's im2col stores stay 128-lane aligned (numerically exact).
# ---------------------------------------------------------------------------
_COUT0 = 128


def _prep_weights(params):
    def flat(w):
        k, cin, cout = w.shape
        return w.reshape(k * cin, cout).astype(jnp.bfloat16)

    p = {}
    w0 = params["c0_w"].reshape(27, 64)
    p["c0"] = (jnp.pad(w0, ((0, 0), (0, _COUT0 - 64))).astype(jnp.bfloat16),
               jnp.pad(params["bn0"][0], ((0, 0), (0, _COUT0 - 64))),
               jnp.pad(params["bn0"][1], ((0, 0), (0, _COUT0 - 64))))
    w1 = jnp.pad(params["c1_w"], ((0, 0), (0, _COUT0 - 64), (0, 0)))
    p["c1"] = (flat(w1),) + params["bn1"]
    p["rb1a"] = (flat(params["rb1_w1"]),) + params["rb1_bn1"]
    p["rb1b"] = (flat(params["rb1_w2"]),) + params["rb1_bn2"]
    p["c2"] = (flat(params["c2_w"]),) + params["bn2"]
    p["c3"] = (flat(params["c3_w"]),) + params["bn3"]
    p["rb2a"] = (flat(params["rb2_w1"]),) + params["rb2_bn1"]
    p["rb2b"] = (flat(params["rb2_w2"]),) + params["rb2_bn2"]
    return p


# ---------------------------------------------------------------------------
# Pallas forward: 3 fused pallas_calls + tiny XLA fc.
# ---------------------------------------------------------------------------
def resnet9_forward(params, x_nchw):
    N = x_nchw.shape[0]
    xh = jnp.transpose(x_nchw, (0, 2, 3, 1)).astype(jnp.bfloat16)     # NHWC bf16
    H, W = xh.shape[1], xh.shape[2]
    lp = _prep_weights(params)

    # Layer-0 im2col built by XLA (tiny: H*W x 27 bf16 per image), tap-major/cin-minor.
    xp = jnp.pad(xh, ((0, 0), (1, 1), (1, 1), (0, 0)))
    patches = jnp.stack([xp[:, dy:dy + H, dx:dx + W, :]
                         for dy in range(3) for dx in range(3)], axis=3)
    patches = patches.reshape(N, H * W, 27)

    # Group A (32x32): c0 [activation1] + c1 [activation2] + maxpool.
    plan_a = (
        _step("c0", H, W, 27, _COUT0, taps=1, emit_raw=True, raw_cout=64),
        _step("c1", H, W, _COUT0, 128, emit_raw=True, pool=True),
    )
    xa, (a1, a2) = conv_chain(patches, [lp["c0"], lp["c1"]], plan_a)

    # Group B (16x16): ResidualBlock(128) + c2 [activation3] + maxpool.
    H2, W2 = H // 2, W // 2
    plan_b = (
        _step("rb1a", H2, W2, 128, 128, save_skip=True),
        _step("rb1b", H2, W2, 128, 128, add_skip=True),
        _step("c2", H2, W2, 128, 256, emit_raw=True, pool=True),
    )
    xb, (a3,) = conv_chain(xa, [lp["rb1a"], lp["rb1b"], lp["c2"]], plan_b)

    # Group C (8x8 -> 4x4 -> 2x2): c3 [activation4] + maxpool + ResidualBlock(256) + maxpool.
    H3, W3 = H2 // 2, W2 // 2
    H4, W4 = H3 // 2, W3 // 2
    plan_c = (
        _step("c3", H3, W3, 256, 256, emit_raw=True, pool=True),
        _step("rb2a", H4, W4, 256, 256, save_skip=True),
        _step("rb2b", H4, W4, 256, 256, add_skip=True, pool=True),
    )
    xc, (a4,) = conv_chain(xb, [lp["c3"], lp["rb2a"], lp["rb2b"]], plan_c)

    # Flatten in PyTorch (C, H, W) order; fc is a tiny matmul -> plain XLA.
    feat = jnp.transpose(xc, (0, 2, 1)).reshape(N, -1).astype(jnp.float32)
    logits = feat @ params["fc_w"] + params["fc_b"]

    def to_nchw(a, h, w):
        return jnp.transpose(a.reshape(N, h, w, a.shape[-1]), (0, 3, 1, 2))

    return (logits, to_nchw(a1, H, W), to_nchw(a2, H, W),
            to_nchw(a3, H2, W2), to_nchw(a4, H3, W3))


# ---------------------------------------------------------------------------
# Pure-XLA mirror (same dataflow / bf16 quantization points) for the self-check.
# ---------------------------------------------------------------------------
def resnet9_reference(params, x_nchw):
    N = x_nchw.shape[0]
    x = jnp.transpose(x_nchw, (0, 2, 3, 1)).astype(jnp.bfloat16)

    def conv(xb, w9, scale, bias, *, residual=None, pool=False):
        cin, cout = w9.shape[1], w9.shape[2]
        acc = jax.lax.conv_general_dilated(
            xb.astype(jnp.float32),
            w9.astype(jnp.float32).reshape(3, 3, cin, cout),
            window_strides=(1, 1), padding=((1, 1), (1, 1)),
            dimension_numbers=("NHWC", "HWIO", "NHWC"))
        y = jnp.maximum(acc * scale.reshape(1, 1, 1, cout)
                        + bias.reshape(1, 1, 1, cout), 0.0)
        if residual is not None:
            y = y + residual.astype(jnp.float32)
        yb = y.astype(jnp.bfloat16)
        if pool:
            n, h, w, c = yb.shape
            yb = yb.reshape(n, h // 2, 2, w // 2, 2, c).max(axis=(2, 4))
        return yb, acc

    x, a1 = conv(x, params["c0_w"], *params["bn0"])
    x, a2 = conv(x, params["c1_w"], *params["bn1"], pool=True)
    skip = x
    x, _ = conv(x, params["rb1_w1"], *params["rb1_bn1"])
    x, _ = conv(x, params["rb1_w2"], *params["rb1_bn2"], residual=skip)
    x, a3 = conv(x, params["c2_w"], *params["bn2"], pool=True)
    x, a4 = conv(x, params["c3_w"], *params["bn3"], pool=True)
    skip = x
    x, _ = conv(x, params["rb2_w1"], *params["rb2_bn1"])
    x, _ = conv(x, params["rb2_w2"], *params["rb2_bn2"], residual=skip, pool=True)

    feat = jnp.transpose(x, (0, 3, 1, 2)).reshape(N, -1).astype(jnp.float32)
    logits = feat @ params["fc_w"] + params["fc_b"]

    def nchw(a):
        return jnp.transpose(a, (0, 3, 1, 2))

    return logits, nchw(a1), nchw(a2), nchw(a3), nchw(a4)


# ---------------------------------------------------------------------------
# Deterministic synthetic parameters (shapes from ResNet9.__init__).  Conv weights are
# stored as (ky*3+kx, Cin, Cout) bf16; BatchNorm is folded to (scale, bias) in f32.
# ---------------------------------------------------------------------------
def _conv_w(key, cin, cout):
    std = (2.0 / (9 * cin)) ** 0.5
    return (std * jax.random.normal(key, (9, cin, cout), jnp.float32)).astype(jnp.bfloat16)


def _fold_bn(key, c, eps=1e-5):
    k1, k2, k3, k4 = jax.random.split(key, 4)
    gamma = 1.0 + 0.1 * jax.random.normal(k1, (c,), jnp.float32)
    beta = 0.1 * jax.random.normal(k2, (c,), jnp.float32)
    mean = 0.1 * jax.random.normal(k3, (c,), jnp.float32)
    var = 1.0 + 0.1 * jax.random.uniform(k4, (c,), jnp.float32)
    scale = gamma / jnp.sqrt(var + eps)
    bias = beta - mean * scale
    return scale.reshape(1, c), bias.reshape(1, c)


def init_params(key, num_classes=10):
    ks = jax.random.split(key, 18)
    p = {}
    p["c0_w"] = _conv_w(ks[0], 3, 64);       p["bn0"] = _fold_bn(ks[1], 64)
    p["c1_w"] = _conv_w(ks[2], 64, 128);     p["bn1"] = _fold_bn(ks[3], 128)
    p["rb1_w1"] = _conv_w(ks[4], 128, 128);  p["rb1_bn1"] = _fold_bn(ks[5], 128)
    p["rb1_w2"] = _conv_w(ks[6], 128, 128);  p["rb1_bn2"] = _fold_bn(ks[7], 128)
    p["c2_w"] = _conv_w(ks[8], 128, 256);    p["bn2"] = _fold_bn(ks[9], 256)
    p["c3_w"] = _conv_w(ks[10], 256, 256);   p["bn3"] = _fold_bn(ks[11], 256)
    p["rb2_w1"] = _conv_w(ks[12], 256, 256); p["rb2_bn1"] = _fold_bn(ks[13], 256)
    p["rb2_w2"] = _conv_w(ks[14], 256, 256); p["rb2_bn2"] = _fold_bn(ks[15], 256)
    p["fc_w"] = 0.03 * jax.random.normal(ks[16], (1024, num_classes), jnp.float32)
    p["fc_b"] = 0.01 * jax.random.normal(ks[17], (1, num_classes), jnp.float32)
    return p


if __name__ == "__main__":
    _roll_is_down()   # establish the pltpu.roll convention eagerly, up front

    key = jax.random.PRNGKey(0)
    pkey, xkey = jax.random.split(key)
    params = init_params(pkey, num_classes=10)
    # Input must be 3x32x32 so the final feature map is 256*2*2 = 1024 (fc in_features).
    x = jax.random.normal(xkey, (2, 3, 32, 32), jnp.float32)

    fwd = jax.jit(resnet9_forward)
    outs = jax.block_until_ready(fwd(params, x))

    logits, a1, a2, a3, a4 = outs
    assert logits.shape == (2, 10)
    assert a1.shape == (2, 64, 32, 32)
    assert a2.shape == (2, 128, 32, 32)
    assert a3.shape == (2, 256, 16, 16)
    assert a4.shape == (2, 256, 8, 8)

    # Numerical check against a pure-XLA reference with identical dataflow / quantization.
    refs = jax.block_until_ready(jax.jit(resnet9_reference)(params, x))
    for got, want in zip(outs, refs):
        got = got.astype(jnp.float32)
        want = want.astype(jnp.float32)
        err = float(jnp.max(jnp.abs(got - want)))
        scale = float(jnp.max(jnp.abs(want))) + 1e-6
        assert err <= 5e-2 * scale, f"mismatch: err={err}, scale={scale}"

    print("KERNEL_OK")
</pallas_src>

<mosaic_0001>
module attributes {stable_mosaic.version = 11 : i64} {
  func.func @kernel(%arg0: memref<8x128xf32, #tpu.memory_space<vmem>>, %arg1: memref<8x128xf32, #tpu.memory_space<vmem>>) attributes {dimension_semantics = [], scalar_prefetch = 0 : i64, scratch_operands = 0 : i64, tpu.core_type = #tpu.core_type<tc>} {
    %c0 = arith.constant 0 : index
    %c0_0 = arith.constant 0 : index
    %0 = vector.load %arg0[%c0, %c0_0] : memref<8x128xf32, #tpu.memory_space<vmem>>, vector<8x128xf32>
    %c1_i32 = arith.constant 1 : i32
    %1 = tpu.dynamic_rotate %0 by %c1_i32 dim 0 : vector<8x128xf32>, i32 -> vector<8x128xf32>
    %c0_1 = arith.constant 0 : index
    %c0_2 = arith.constant 0 : index
    %2 = vector.load %arg1[%c0_1, %c0_2] : memref<8x128xf32, #tpu.memory_space<vmem>>, vector<8x128xf32>
    tpu.vector_store %arg1[%c0_1, %c0_2], %1 {strides = array<i32>} : memref<8x128xf32, #tpu.memory_space<vmem>>, vector<8x128xf32>,
    return
  }
}

</mosaic_0001>

<bundles_post_ra>
// kernel: tpu_custom_call.1
= control target key start
LH: loop header
LB: loop body
LE: loop exit
PB: predicated region body
PF: predicated region fallthrough
CT: control target
= control target key end

     0   :  { %6 = vsyncpa [#allocation3], 0  ;;  %s103_s0 = inlined_call_operand.hbm [shape: f32[8,128], index: 0, kind: input, shape index: {}]   ;;  %s104_s1 = inlined_call_operand.hbm [shape: f32[8,128], index: 1, kind: output, shape index: {}]  }
   0x1   :  { %7 = vsyncpa [#allocation4], 0  ;;  %s85_s6 = smov [#allocation2]  }
   0x2   :  { %s14_s7 = sshll.u32 %s85_s6, 4  ;;  %s15_s7 = int_to_ptr.vmem [resolvable:$true] %s14_s7 }
   0x3   :  { %s49_s8 = scalar_lea.vmem %s15_s7, 128  ;;  %p54_p1 = scmp.lt.s32.totalorder %s15_s7, %s15_s7 }
   0x4   :  { %p50_p0 = scmp.ne.s32.totalorder %s15_s7, %s49_s8  ;;  %p55_p2 = scmp.lt.s32.totalorder %s49_s8, %s49_s8 }
   0x6   :  { %p56_p3 = por %p55_p2, %p54_p1 }
   0x8   :  { %p57_p4 = pnand %p56_p3, %p50_p0 }
   0xa   :  { %60 = shalt.err (!%p57_p4)
}
   0xb   :  { %17 = dma.hbm_to_vmem [thread:$0]  %s103_s0, 128, %s15_s7, [#allocation3]  }
   0xc   :  { %81 = dma.done.wait [#allocation3], 128  }
   0xd   :  { %82 = vsyncadd [#allocation3], 4294967168  ;;  %s86_s11 = smov [#allocation5]   ;;  %v21_v0 = vld [vmem:[#allocation2] sm:$0xff] }
   0xe   :  { %s30_s12 = sshll.u32 %s86_s11, 4  ;;  %v22_v1 = vrot.slane %v21_v0, 7  ;;  %s31_s12 = int_to_ptr.vmem [resolvable:$true] %s30_s12 }
   0xf   :  { %s61_s13 = scalar_lea.vmem %s31_s12, 128  ;;  %p66_p6 = scmp.lt.s32.totalorder %s31_s12, %s31_s12 }
  0x10   :  { %23 = vst [vmem:[#allocation5] sm:$0xff] %v22_v1  ;;  %p62_p5 = scmp.ne.s32.totalorder %s31_s12, %s61_s13  ;;  %p67_p7 = scmp.lt.s32.totalorder %s61_s13, %s61_s13 }
  0x12   :  { %p68_p8 = por %p67_p7, %p66_p6 }
  0x14   :  { %p69_p9 = pnand %p68_p8, %p62_p5 }
  0x16   :  { %72 = shalt.err (!%p69_p9)
}
  0x17   :  { %33 = dma.vmem_to_hbm [thread:$0]  %s31_s12, 128, %s104_s1, [#allocation4]  }
  0x18   :  { %83 = dma.done.wait [#allocation4], 128  }
  0x19   :  { %84 = vsyncadd [#allocation4], 4294967168 }
  0x1a   :  { %37 = vsyncpa [#allocation3], 1 }
  0x1b   :  { %38 = vsyncpa [#allocation4], 1 }

</bundles_post_ra>
